<compile_context>
chip_gen: v5e
topology: v5e:2x2
jax: 0.10.0
libtpu: 0.0.40
codegen_flags: <defaults>
</compile_context>

<pallas_src>
import jax
import jax.numpy as jnp
from jax.experimental import pallas as pl
from jax.experimental.pallas import tpu as pltpu


def _round_up(x, m):
    return ((x + m - 1) // m) * m


def critic_kernel(s_ref, a_ref, w1s_ref, w1a_ref, w2_ref, tail_ref, o_ref):
    """One batch tile: two MXU matmuls + bias/ReLU on VPU + final lane-reduce."""
    b1 = tail_ref[0:1, :]          # (1, H) f32
    b2 = tail_ref[1:2, :]          # (1, H) f32
    w3_row = tail_ref[2:3, :]      # (1, H) f32 (third-layer weight as a row)
    b3 = tail_ref[3:4, 0:1]        # (1, 1) f32

    # Layer 1: concat([state, action]) @ W1 == state @ W1_s + action @ W1_a.
    h1 = (
        jnp.dot(s_ref[...], w1s_ref[...], preferred_element_type=jnp.float32)
        + jnp.dot(a_ref[...], w1a_ref[...], preferred_element_type=jnp.float32)
        + b1
    )
    h1 = jnp.maximum(h1, 0.0)

    # Layer 2 (cast activation to the weight dtype so bf16 weights hit the MXU
    # natively; accumulation stays f32).
    h2 = (
        jnp.dot(h1.astype(w2_ref.dtype), w2_ref[...],
                preferred_element_type=jnp.float32)
        + b2
    )
    h2 = jnp.maximum(h2, 0.0)

    # Layer 3: VPU multiply + XLU lane reduction (no 1-wide MXU matmul).
    q = jnp.sum(h2 * w3_row, axis=-1, keepdims=True) + b3
    o_ref[...] = q.astype(o_ref.dtype)


def critic_forward(state, action, params, *, tile_b=512,
                   compute_dtype=jnp.float32):
    """state: [B, Ds], action: [B, Da]; returns q-values [B, 1] (float32)."""
    w1, b1, w2, b2, w3, b3 = params
    B, Ds = state.shape
    Da = action.shape[1]
    Din = Ds + Da
    H = w2.shape[0]

    # Split W1 once (weights, not activations) -> no per-call activation concat.
    w1_s = w1[:Ds].astype(compute_dtype)
    w1_a = w1[Ds:].astype(compute_dtype)
    w2_c = w2.astype(compute_dtype)
    s_c = state.astype(compute_dtype)
    a_c = action.astype(compute_dtype)

    # Pack b1, b2, w3 (as a row) and b3 into one small f32 operand.
    tail = jnp.concatenate(
        [
            b1.reshape(1, H),
            b2.reshape(1, H),
            w3.reshape(1, H),
            jnp.pad(b3.reshape(1, 1), ((0, 0), (0, H - 1))),
        ],
        axis=0,
    ).astype(jnp.float32)

    # Batch tiling: clamp the tile to round_up(B, 8) so small/medium batches
    # run as a single grid step with minimal padding; large batches pipeline.
    tile_b = max(8, (min(tile_b, _round_up(B, 8)) // 8) * 8)
    b_pad = _round_up(B, tile_b)
    if b_pad != B:
        s_c = jnp.pad(s_c, ((0, b_pad - B), (0, 0)))
        a_c = jnp.pad(a_c, ((0, b_pad - B), (0, 0)))
    grid = (b_pad // tile_b,)

    itemsize = jnp.dtype(compute_dtype).itemsize
    cost = pl.CostEstimate(
        flops=int(2 * b_pad * (Din * H + H * H + H)),
        transcendentals=0,
        bytes_accessed=int(
            itemsize * (b_pad * Din + Din * H + H * H)   # inputs + weights
            + 4 * (4 * H + b_pad)                        # tail + output
        ),
    )

    q = pl.pallas_call(
        critic_kernel,
        out_shape=jax.ShapeDtypeStruct((b_pad, 1), jnp.float32),
        grid=grid,
        in_specs=[
            pl.BlockSpec((tile_b, Ds), lambda i: (i, 0)),   # state tile
            pl.BlockSpec((tile_b, Da), lambda i: (i, 0)),   # action tile
            pl.BlockSpec((Ds, H), lambda i: (0, 0)),        # W1_state (resident)
            pl.BlockSpec((Da, H), lambda i: (0, 0)),        # W1_action (resident)
            pl.BlockSpec((H, H), lambda i: (0, 0)),         # W2 (resident)
            pl.BlockSpec((4, H), lambda i: (0, 0)),         # packed b1,b2,w3,b3
        ],
        out_specs=pl.BlockSpec((tile_b, 1), lambda i: (i, 0)),
        compiler_params=pltpu.CompilerParams(
            dimension_semantics=("parallel",),  # 2x TC sharding on v7x
        ),
        cost_estimate=cost,
    )(s_c, a_c, w1_s, w1_a, w2_c, tail)

    return q[:B]


def init_critic_params(key, input_size, hidden_size):
    """Deterministic init mirroring nn.Linear default (U[-1/sqrt(fan_in), +])."""
    ks = jax.random.split(key, 6)

    def linear(kw, kb, fan_in, fan_out):
        bound = 1.0 / jnp.sqrt(jnp.float32(fan_in))
        w = jax.random.uniform(kw, (fan_in, fan_out), jnp.float32, -bound, bound)
        b = jax.random.uniform(kb, (1, fan_out), jnp.float32, -bound, bound)
        return w, b

    w1, b1 = linear(ks[0], ks[1], input_size, hidden_size)
    w2, b2 = linear(ks[2], ks[3], hidden_size, hidden_size)
    w3, b3 = linear(ks[4], ks[5], hidden_size, 1)
    return (w1, b1, w2, b2, w3, b3)


def critic_reference(state, action, params):
    x = jnp.concatenate([state, action], axis=1)
    w1, b1, w2, b2, w3, b3 = params
    h1 = jnp.maximum(x @ w1 + b1, 0.0)
    h2 = jnp.maximum(h1 @ w2 + b2, 0.0)
    return h2 @ w3 + b3


if __name__ == "__main__":
    key = jax.random.PRNGKey(0)
    k_state, k_action, k_params = jax.random.split(key, 3)

    B = 8
    STATE_DIM = 24
    ACTION_DIM = 8
    INPUT_SIZE = STATE_DIM + ACTION_DIM   # 32
    HIDDEN = 32

    state = jax.random.normal(k_state, (B, STATE_DIM), jnp.float32)
    action = jax.random.normal(k_action, (B, ACTION_DIM), jnp.float32)
    params = init_critic_params(k_params, INPUT_SIZE, HIDDEN)

    # Small-batch f32 path (single grid step, tile clamped to 8 rows).
    q = jax.block_until_ready(critic_forward(state, action, params))
    q_ref = critic_reference(state, action, params)
    assert q.shape == (B, 1), q.shape
    assert jnp.allclose(q, q_ref, atol=1e-4, rtol=1e-4), (q, q_ref)

    # Medium batch with default tile: single grid step, <=7 padded rows.
    B2 = 300
    state2 = jax.random.normal(jax.random.PRNGKey(1), (B2, STATE_DIM), jnp.float32)
    action2 = jax.random.normal(jax.random.PRNGKey(2), (B2, ACTION_DIM), jnp.float32)
    q2 = jax.block_until_ready(critic_forward(state2, action2, params))
    q2_ref = critic_reference(state2, action2, params)
    assert q2.shape == (B2, 1), q2.shape
    assert jnp.allclose(q2, q2_ref, atol=1e-4, rtol=1e-4), (q2, q2_ref)

    # Multi-tile batch grid (padding + 3 pipelined tiles).
    q2_tiled = jax.block_until_ready(
        critic_forward(state2, action2, params, tile_b=128))
    assert jnp.allclose(q2_tiled, q2_ref, atol=1e-4, rtol=1e-4), (q2_tiled, q2_ref)

    # bf16 MXU path (f32 accumulation); loose tolerance for bf16 operands.
    q2_bf16 = jax.block_until_ready(
        critic_forward(state2, action2, params, tile_b=128,
                       compute_dtype=jnp.bfloat16))
    assert jnp.allclose(q2_bf16, q2_ref, atol=1e-1, rtol=1e-1), (q2_bf16, q2_ref)

    print("KERNEL_OK")
</pallas_src>

<mosaic_0001>
module attributes {stable_mosaic.version = 11 : i64} {
  func.func @critic_kernel(%arg0: i32, %arg1: memref<8x24xf32, #tpu.memory_space<vmem>>, %arg2: memref<8x8xf32, #tpu.memory_space<vmem>>, %arg3: memref<24x32xf32, #tpu.memory_space<vmem>>, %arg4: memref<8x32xf32, #tpu.memory_space<vmem>>, %arg5: memref<32x32xf32, #tpu.memory_space<vmem>>, %arg6: memref<4x32xf32, #tpu.memory_space<vmem>>, %arg7: memref<8x1xf32, #tpu.memory_space<vmem>>) attributes {dimension_semantics = [#tpu.dimension_semantics<parallel>], iteration_bounds = array<i64: 1>, scalar_prefetch = 0 : i64, scratch_operands = 0 : i64, tpu.core_type = #tpu.core_type<tc>, window_params = [{transform_indices = @transform_0, window_bounds = array<i64: 8, 24>}, {transform_indices = @transform_1, window_bounds = array<i64: 8, 8>}, {pipeline_mode = #tpu.pipeline_mode<synchronous>, transform_indices = @transform_2, window_bounds = array<i64: 24, 32>}, {pipeline_mode = #tpu.pipeline_mode<synchronous>, transform_indices = @transform_3, window_bounds = array<i64: 8, 32>}, {pipeline_mode = #tpu.pipeline_mode<synchronous>, transform_indices = @transform_4, window_bounds = array<i64: 32, 32>}, {pipeline_mode = #tpu.pipeline_mode<synchronous>, transform_indices = @transform_5, window_bounds = array<i64: 4, 32>}, {transform_indices = @transform_6, window_bounds = array<i64: 8, 1>}]} {
    %c0 = arith.constant 0 : index
    %c0_0 = arith.constant 0 : index
    %0 = vector.load %arg6[%c0, %c0_0] : memref<4x32xf32, #tpu.memory_space<vmem>>, vector<1x32xf32>
    %c1 = arith.constant 1 : index
    %c0_1 = arith.constant 0 : index
    %1 = vector.load %arg6[%c1, %c0_1] : memref<4x32xf32, #tpu.memory_space<vmem>>, vector<1x32xf32>
    %c2 = arith.constant 2 : index
    %c0_2 = arith.constant 0 : index
    %2 = vector.load %arg6[%c2, %c0_2] : memref<4x32xf32, #tpu.memory_space<vmem>>, vector<1x32xf32>
    %c3 = arith.constant 3 : index
    %c0_3 = arith.constant 0 : index
    %3 = vector.load %arg6[%c3, %c0_3] : memref<4x32xf32, #tpu.memory_space<vmem>>, vector<1x1xf32>
    %c0_4 = arith.constant 0 : index
    %c0_5 = arith.constant 0 : index
    %4 = vector.load %arg1[%c0_4, %c0_5] : memref<8x24xf32, #tpu.memory_space<vmem>>, vector<8x24xf32>
    %c0_6 = arith.constant 0 : index
    %c0_7 = arith.constant 0 : index
    %5 = vector.load %arg3[%c0_6, %c0_7] : memref<24x32xf32, #tpu.memory_space<vmem>>, vector<24x32xf32>
    %cst = arith.constant dense<0.000000e+00> : vector<8x32xf32>
    %6 = tpu.matmul %4, %5, %cst {dimension_numbers = #tpu.dot_dimension_numbers<[1], [0], [0], [1], [0, 0, 1, 1], [], []>} : vector<8x24xf32>, vector<24x32xf32>, vector<8x32xf32> -> vector<8x32xf32>
    %c0_8 = arith.constant 0 : index
    %c0_9 = arith.constant 0 : index
    %7 = vector.load %arg2[%c0_8, %c0_9] : memref<8x8xf32, #tpu.memory_space<vmem>>, vector<8x8xf32>
    %c0_10 = arith.constant 0 : index
    %c0_11 = arith.constant 0 : index
    %8 = vector.load %arg4[%c0_10, %c0_11] : memref<8x32xf32, #tpu.memory_space<vmem>>, vector<8x32xf32>
    %cst_12 = arith.constant dense<0.000000e+00> : vector<8x32xf32>
    %9 = tpu.matmul %7, %8, %cst_12 {dimension_numbers = #tpu.dot_dimension_numbers<[1], [0], [0], [1], [0, 0, 1, 1], [], []>} : vector<8x8xf32>, vector<8x32xf32>, vector<8x32xf32> -> vector<8x32xf32>
    %10 = arith.addf %6, %9 : vector<8x32xf32>
    %11 = vector.broadcast %0 : vector<1x32xf32> to vector<8x32xf32>
    %12 = arith.addf %10, %11 : vector<8x32xf32>
    %cst_13 = arith.constant 0.000000e+00 : f32
    %13 = vector.broadcast %cst_13 : f32 to vector<8x32xf32>
    %14 = arith.maximumf %12, %13 : vector<8x32xf32>
    %c0_14 = arith.constant 0 : index
    %c0_15 = arith.constant 0 : index
    %15 = vector.load %arg5[%c0_14, %c0_15] : memref<32x32xf32, #tpu.memory_space<vmem>>, vector<32x32xf32>
    %cst_16 = arith.constant dense<0.000000e+00> : vector<8x32xf32>
    %16 = tpu.matmul %14, %15, %cst_16 {dimension_numbers = #tpu.dot_dimension_numbers<[1], [0], [0], [1], [0, 0, 1, 1], [], []>} : vector<8x32xf32>, vector<32x32xf32>, vector<8x32xf32> -> vector<8x32xf32>
    %17 = vector.broadcast %1 : vector<1x32xf32> to vector<8x32xf32>
    %18 = arith.addf %16, %17 : vector<8x32xf32>
    %cst_17 = arith.constant 0.000000e+00 : f32
    %19 = vector.broadcast %cst_17 : f32 to vector<8x32xf32>
    %20 = arith.maximumf %18, %19 : vector<8x32xf32>
    %21 = vector.broadcast %2 : vector<1x32xf32> to vector<8x32xf32>
    %22 = arith.mulf %20, %21 : vector<8x32xf32>
    %cst_18 = arith.constant dense<0.000000e+00> : vector<8xf32>
    %23 = vector.multi_reduction <add>, %22, %cst_18 [1] : vector<8x32xf32> to vector<8xf32>
    %24 = vector.shape_cast %23 : vector<8xf32> to vector<8x1xf32>
    %25 = vector.broadcast %3 : vector<1x1xf32> to vector<8x1xf32>
    %26 = arith.addf %24, %25 : vector<8x1xf32>
    %c0_19 = arith.constant 0 : index
    %c0_20 = arith.constant 0 : index
    %27 = vector.load %arg7[%c0_19, %c0_20] : memref<8x1xf32, #tpu.memory_space<vmem>>, vector<8x1xf32>
    tpu.vector_store %arg7[%c0_19, %c0_20], %26 {strides = array<i32>} : memref<8x1xf32, #tpu.memory_space<vmem>>, vector<8x1xf32>,
    return
  }
  func.func @transform_0(%arg0: i32) -> (i32, i32) {
    %c0_i32 = arith.constant 0 : i32
    %c0_i32_0 = arith.constant 0 : i32
    return %arg0, %c0_i32 : i32, i32
  }
  func.func @transform_1(%arg0: i32) -> (i32, i32) {
    %c0_i32 = arith.constant 0 : i32
    %c0_i32_0 = arith.constant 0 : i32
    return %arg0, %c0_i32 : i32, i32
  }
  func.func @transform_2(%arg0: i32) -> (i32, i32) {
    %c0_i32 = arith.constant 0 : i32
    %c0_i32_0 = arith.constant 0 : i32
    %c0_i32_1 = arith.constant 0 : i32
    return %c0_i32, %c0_i32_0 : i32, i32
  }
  func.func @transform_3(%arg0: i32) -> (i32, i32) {
    %c0_i32 = arith.constant 0 : i32
    %c0_i32_0 = arith.constant 0 : i32
    %c0_i32_1 = arith.constant 0 : i32
    return %c0_i32, %c0_i32_0 : i32, i32
  }
  func.func @transform_4(%arg0: i32) -> (i32, i32) {
    %c0_i32 = arith.constant 0 : i32
    %c0_i32_0 = arith.constant 0 : i32
    %c0_i32_1 = arith.constant 0 : i32
    return %c0_i32, %c0_i32_0 : i32, i32
  }
  func.func @transform_5(%arg0: i32) -> (i32, i32) {
    %c0_i32 = arith.constant 0 : i32
    %c0_i32_0 = arith.constant 0 : i32
    %c0_i32_1 = arith.constant 0 : i32
    return %c0_i32, %c0_i32_0 : i32, i32
  }
  func.func @transform_6(%arg0: i32) -> (i32, i32) {
    %c0_i32 = arith.constant 0 : i32
    %c0_i32_0 = arith.constant 0 : i32
    return %arg0, %c0_i32 : i32, i32
  }
}

</mosaic_0001>

<bundles_post_ra>
// kernel: tpu_custom_call.1
= control target key start
LH: loop header
LB: loop body
LE: loop exit
PB: predicated region body
PF: predicated region fallthrough
CT: control target
= control target key end

     0   :  { %11 = vsyncpa [#allocation3], 0  ;;  %s414_s0 = inlined_call_operand.hbm [shape: f32[8,24], index: 0, kind: input, shape index: {}]   ;;  %s415_s1 = inlined_call_operand.hbm [shape: f32[8,8], index: 1, kind: input, shape index: {}]   ;;  %s416_s2 = inlined_call_operand.hbm [shape: f32[24,32], index: 2, kind: input, shape index: {}]   ;;  %s417_s3 = inlined_call_operand.hbm [shape: f32[8,32], index: 3, kind: input, shape index: {}]   ;;  %s418_s4 = inlined_call_operand.hbm [shape: f32[32,32], index: 4, kind: input, shape index: {}]   ;;  %s419_s5 = inlined_call_operand.vmem [shape: f32[4,32], index: 5, kind: input, shape index: {}]   ;;  %s420_s6 = inlined_call_operand.vmem [shape: f32[8,1], index: 6, kind: output, shape index: {}]  }
   0x1   :  { %12 = vsyncpa [#allocation5], 0  ;;  %s30_s23 = sshll.u32 %s415_s1, 4  ;;  %s31_s23 = int_to_ptr.hbm [resolvable:$true] %s30_s23 }
   0x2   :  { %13 = vsyncpa [#allocation8], 0  ;;  %s342_s24 = smov [#allocation4]   ;;  %s54_s28 = sshll.u32 %s417_s3, 4  ;;  %s55_s28 = int_to_ptr.hbm [resolvable:$true] %s54_s28 }
   0x3   :  { %s32_s25 = sshll.u32 %s342_s24, 4  ;;  %s343_s29 = smov [#allocation7]   ;;  %s33_s25 = int_to_ptr.vmem [resolvable:$true] %s32_s25 }
   0x4   :  { %35 = dma.hbm_to_vmem [thread:$0]  %s31_s23, 128, %s33_s25, [#allocation5]  }
   0x5   :  { %s56_s30 = sshll.u32 %s343_s29, 4  ;;  %s19_s9 = sshll.u32 %s414_s0, 4  ;;  %s57_s30 = int_to_ptr.vmem [resolvable:$true] %s56_s30  ;;  %s20_s9 = int_to_ptr.hbm [resolvable:$true] %s19_s9 }
   0x6   :  { %59 = dma.hbm_to_vmem [thread:$0]  %s55_s28, 128, %s57_s30, [#allocation8]  }
   0x7   :  { %s40_s11 = sshll.u32 %s416_s2, 4  ;;  %s344_s12 = smov [#allocation2]   ;;  %s41_s11 = int_to_ptr.hbm [resolvable:$true] %s40_s11 }
   0x8   :  { %s21_s13 = sshll.u32 %s344_s12, 4  ;;  %s345_s3 = smov [#allocation6]   ;;  %s22_s13 = int_to_ptr.vmem [resolvable:$true] %s21_s13 }
   0x9   :  { %24 = dma.hbm_to_vmem [thread:$0]  %s20_s9, 128, %s22_s13, [#allocation3]  }
   0xa   :  { %s42_s14 = sshll.u32 %s345_s3, 4  ;;  %s346_s15 = smov 128   ;;  %s43_s14 = int_to_ptr.vmem [resolvable:$true] %s42_s14 }
   0xb   :  { %s347_s16 = smov 8   ;;  %s64_s18 = sshll.u32 %s418_s4, 4  ;;  %s65_s18 = int_to_ptr.hbm [resolvable:$true] %s64_s18 }
   0xc   :  { %48 = dma.hbm_to_vmem [thread:$0]  %s41_s11, 384, %s43_s14, [#allocation5], %s346_s15, %s346_s15, %s347_s16  }
   0xd   :  { %s348_s19 = smov [#allocation9]  }
   0xe   :  { %s66_s20 = sshll.u32 %s348_s19, 4  ;;  %s67_s20 = int_to_ptr.vmem [resolvable:$true] %s66_s20 }
   0xf   :  { %72 = dma.hbm_to_vmem [thread:$0]  %s65_s18, 512, %s67_s20, [#allocation8], %s346_s15, %s346_s15, %s347_s16  }
  0x10   :  { %336 = dma.done.wait [#allocation3], 128  }
  0x11   :  { %337 = vsyncadd [#allocation3], 4294967168 }
  0x12   :  { %338 = dma.done.wait [#allocation5], 512  }
  0x13   :  { %339 = vsyncadd [#allocation5], 4294966784 }
  0x14   :  { %340 = dma.done.wait [#allocation8], 640  }
  0x15   :  { %341 = vsyncadd [#allocation8], 4294966656  ;;  %vm105_vm0 = vcmask 64512   ;;  %v102_v0 = vld [vmem:[#allocation6 + $0x10] sm:$0xff]  ;;  %v101_v1 = vld [vmem:[#allocation6 + $0x8] sm:$0xff]  ;;  %vm129_vm1 = vcmask 195584  }
  0x16   :  { %v104_v2 = vld [vmem:[#allocation7] sm:$0xff]  ;;  %146 = vmatpush.msra.mxu1 %v102_v0  ;;  %v100_v3 = vld [vmem:[#allocation6] sm:$0xff]  ;;  %v99_v5 = vld [vmem:[#allocation2] sm:$0xff]  ;;  %vm161_vm2 = vcmask 261120   ;;  %vm193_vm3 = vcmask 7168  }
  0x17   :  { %124 = vmatpush.msra.mxu0 %v104_v2  ;;  %v103_v4 = vld [vmem:[#allocation4] sm:$0xff]  ;;  %v158_v7 = vld [vmem:[#allocation9 + $0x10] sm:$0xff]  ;;  %v157_v8 = vld [vmem:[#allocation9 + $0x8] sm:$0xff] }
  0x18   :  { %202 = vmatmul.msk.f32.vlgmr.msra.gmra.mxu0 %vm105_vm0, %v103_v4  ;;  %147 = vmatpush.msra.mxu1 %v101_v1  ;;  %v159_v6 = vld [vmem:[#allocation9 + $0x18] sm:$0xff]  ;;  %v156_v9 = vld [vmem:[#allocation9] sm:$0xff]  ;;  %v212_v11 = vld [vmem:[%s419_s5] ss:$0 sm:$0xff] }
  0x19   :  { %177 = vmatpush.msra.mxu2 %v159_v6  ;;  %v213_v16 = vld [vmem:[%s419_s5 + $0x1] ss:$0 sm:$0xff]  ;;  %v214_v19 = vld [vmem:[%s419_s5 + $0x2] ss:$0 sm:$0xff]  ;;  %v215_v23 = vld [vmem:[%s419_s5 + $0x3] ss:$0 sm:$0xff] }
  0x1a   :  { %148 = vmatpush.msra.mxu1 %v100_v3 }
  0x1b   :  { %203 = vmatmul.msk.f32.vlgmr.msra.gmra.mxu1 %vm129_vm1, %v99_v5  ;;  %178 = vmatpush.msra.mxu2 %v158_v7 }
  0x1d   :  { %179 = vmatpush.msra.mxu2 %v157_v8 }
  0x1f   :  { %180 = vmatpush.msra.mxu2 %v156_v9 }
  0x95   :  { %v126_v10 = vpop.f32.mrf.mxu0 }
  0x98   :  { %v150_v12 = vpop.f32.mrf.mxu1 }
  0x99   :  { %v151_v13 = vadd.f32 %v150_v12, %v126_v10 }
  0x9b   :  { %v154_v14 = vadd.f32 %v212_v11, %v151_v13 }
  0x9d   :  { %v155_v15 = vmax.f32 %v154_v14, 0.0 }
  0x9f   :  { %204 = vmatmul.msk.f32.vlgmr.msra.gmra.mxu2 %vm161_vm2, %v155_v15 }
 0x122   :  { %v182_v17 = vpop.f32.mrf.mxu2 }
 0x123   :  { %v183_v18 = vadd.f32 %v213_v16, %v182_v17 }
 0x125   :  { %v185_v20 = vmax.f32 %v183_v18, 0.0 }
 0x127   :  { %v187_v21 = vmul.f32 %v214_v19, %v185_v20 }
 0x129   :  { %v188_v22 = vsel %vm161_vm2, %v187_v21, 0.0 }
 0x12a   :  { %189 = vadd.xlane.f32.xlu0 %v188_v22 }
 0x19d   :  { %v190_v24 = vpop.xlane.xlu0 %189 }
 0x19e   :  { %v192_v25 = vadd.f32 %v215_v23, %v190_v24 }
 0x1a0   :  { %194 = vst.msk [vmem:[%s420_s6] sm:$0xff] %vm193_vm3, %v192_v25 }
 0x1a1   :  { %199 = vsyncpa [#allocation3], 1 }
 0x1a2   :  { %200 = vsyncpa [#allocation5], 1 }
 0x1a3   :  { %201 = vsyncpa [#allocation8], 1 }

</bundles_post_ra>
